<compile_context>
chip_gen: v7x
topology: tpu7x:2x2x1
jax: 0.10.0
libtpu: 0.0.40
codegen_flags: <defaults>
</compile_context>

<pallas_src>
import jax
import jax.numpy as jnp
from jax.experimental import pallas as pl
from jax.experimental.pallas import tpu as pltpu


def gaussian_kernel(x_ref, w_ref, b_ref, noise_ref, mu_ref, lv_ref, z_ref):
    z_dim = noise_ref.shape[-1]

    # One fused MXU matmul producing [mu | log_var], f32 accumulation.
    h = jnp.dot(x_ref[...], w_ref[...], preferred_element_type=jnp.float32)
    h = h + b_ref[...].astype(jnp.float32)

    mu = h[:, :z_dim]
    lv = h[:, z_dim:]

    # Reparameterize: z = mu + noise * exp(log_var / 2)   (exp -> EUP slot)
    std = jnp.exp(lv * 0.5)
    z = mu + noise_ref[...].astype(jnp.float32) * std

    # Direct stores (no concat temp / XLU relayout, no wrapper slicing pass).
    mu_ref[...] = mu.astype(mu_ref.dtype)
    lv_ref[...] = lv.astype(lv_ref.dtype)
    z_ref[...] = z.astype(z_ref.dtype)


def fuse_gaussian_params(w_mu, b_mu, w_lv, b_lv):
    """Fuse the two linear heads once (call at parameter init, not per forward)."""
    w_cat = jnp.concatenate([w_mu, w_lv], axis=1)                    # (in_dim, 2*z_dim)
    b_cat = jnp.concatenate([b_mu.reshape(1, -1), b_lv.reshape(1, -1)], axis=1)
    return w_cat, b_cat


def _choose_batch_tile(n, in_dim, z_dim, itemsize, row_budget_bytes):
    """Rows per grid step: as large as the VMEM row-tile budget allows.

    Per row we double-buffer x (in_dim), noise (z_dim) and mu/lv/z (3*z_dim).
    """
    per_row = 2 * (in_dim + 4 * z_dim) * itemsize
    tm = row_budget_bytes // max(per_row, 1)
    n8 = max(8, ((n + 7) // 8) * 8)          # no point tiling past the batch
    tm = max(8, min(int(tm), 4096, n8))
    return (tm // 8) * 8                      # f32 sublane multiple


def gaussian_forward(x, w_cat, b_cat, noise):
    """x: (N, in_dim); w_cat: (in_dim, 2*z_dim); b_cat: (1, 2*z_dim); noise: (N, z_dim).

    Returns (mu, log_var, z), each (N, z_dim).
    """
    n, in_dim = x.shape
    two_z = w_cat.shape[1]
    z_dim = two_z // 2
    dtype = x.dtype
    itemsize = jnp.dtype(dtype).itemsize

    # VMEM budgeting: resident fused weights (single-buffered) + double-buffered
    # row tiles, kept comfortably under v7x's 64 MiB physical VMEM.
    weight_bytes = (in_dim * two_z + two_z) * jnp.dtype(w_cat.dtype).itemsize
    total_budget = 40 << 20
    row_budget = max(total_budget - weight_bytes, 4 << 20)
    tm = _choose_batch_tile(n, in_dim, z_dim, itemsize, row_budget)

    row_tile_bytes = 2 * tm * (in_dim + 4 * z_dim) * itemsize
    vmem_limit = int(min(max(weight_bytes + row_tile_bytes + (4 << 20), 32 << 20),
                         100 << 20))
    # TODO(synk): if in_dim is so large that the resident weight block alone no
    # longer fits VMEM (notably v7x's 64 MiB), add a K grid axis ("arbitrary")
    # with an f32 accumulator instead of shrinking tm.
    # TODO(synk): on v7x, consider pltpu.CORE_PARALLEL on the batch axis and
    # confirm both TensorCores are busy in the trace.

    grid = (pl.cdiv(n, tm),)   # ragged last block handled by Pallas masking

    mu, lv, z = pl.pallas_call(
        gaussian_kernel,
        out_shape=(
            jax.ShapeDtypeStruct((n, z_dim), dtype),
            jax.ShapeDtypeStruct((n, z_dim), dtype),
            jax.ShapeDtypeStruct((n, z_dim), dtype),
        ),
        grid_spec=pltpu.PrefetchScalarGridSpec(
            num_scalar_prefetch=0,
            grid=grid,
            in_specs=[
                pl.BlockSpec((tm, in_dim), lambda i: (i, 0)),            # x tile
                pl.BlockSpec((in_dim, two_z), lambda i: (0, 0),
                             pipeline_mode=pl.Buffered(1)),              # fused W (resident)
                pl.BlockSpec((1, two_z), lambda i: (0, 0),
                             pipeline_mode=pl.Buffered(1)),              # fused b (resident)
                pl.BlockSpec((tm, z_dim), lambda i: (i, 0)),             # noise tile
            ],
            out_specs=(
                pl.BlockSpec((tm, z_dim), lambda i: (i, 0)),             # mu
                pl.BlockSpec((tm, z_dim), lambda i: (i, 0)),             # log_var
                pl.BlockSpec((tm, z_dim), lambda i: (i, 0)),             # z
            ),
        ),
        compiler_params=pltpu.CompilerParams(
            dimension_semantics=("parallel",),
            vmem_limit_bytes=vmem_limit,
        ),
    )(x, w_cat, b_cat, noise)
    return mu, lv, z


def reference_forward(x, w_mu, b_mu, w_lv, b_lv, noise):
    mu = x @ w_mu + b_mu
    lv = x @ w_lv + b_lv
    z = mu + noise * jnp.exp(lv / 2.0)
    return mu, lv, z


if __name__ == "__main__":
    key = jax.random.PRNGKey(0)
    batch, in_dim, z_dim = 8, 32, 16

    k_x, k_wmu, k_bmu, k_wlv, k_blv, k_noise = jax.random.split(key, 6)

    x = jax.random.normal(k_x, (batch, in_dim), dtype=jnp.float32)

    # Deterministic parameter init (PyTorch nn.Linear-style uniform bound).
    bound = 1.0 / jnp.sqrt(in_dim)
    w_mu = jax.random.uniform(k_wmu, (in_dim, z_dim), minval=-bound, maxval=bound,
                              dtype=jnp.float32)
    b_mu = jax.random.uniform(k_bmu, (1, z_dim), minval=-bound, maxval=bound,
                              dtype=jnp.float32)
    w_lv = jax.random.uniform(k_wlv, (in_dim, z_dim), minval=-bound, maxval=bound,
                              dtype=jnp.float32)
    b_lv = jax.random.uniform(k_blv, (1, z_dim), minval=-bound, maxval=bound,
                              dtype=jnp.float32)

    # Training-mode reparameterization noise (randn_like), generated in JAX.
    noise = jax.random.normal(k_noise, (batch, z_dim), dtype=jnp.float32)

    # Fuse the two heads once, outside the forward path.
    w_cat, b_cat = fuse_gaussian_params(w_mu, b_mu, w_lv, b_lv)

    mu, log_var, z = gaussian_forward(x, w_cat, b_cat, noise)
    jax.block_until_ready((mu, log_var, z))

    mu_r, lv_r, z_r = reference_forward(x, w_mu, b_mu, w_lv, b_lv, noise)
    assert jnp.allclose(mu, mu_r, atol=1e-5, rtol=1e-5)
    assert jnp.allclose(log_var, lv_r, atol=1e-5, rtol=1e-5)
    assert jnp.allclose(z, z_r, atol=1e-5, rtol=1e-5)

    print("KERNEL_OK")
</pallas_src>

<mosaic_0001>
module attributes {stable_mosaic.version = 11 : i64} {
  func.func @gaussian_kernel(%arg0: i32, %arg1: memref<8x32xf32, #tpu.memory_space<vmem>>, %arg2: memref<32x32xf32, #tpu.memory_space<vmem>>, %arg3: memref<1x32xf32, #tpu.memory_space<vmem>>, %arg4: memref<8x16xf32, #tpu.memory_space<vmem>>, %arg5: memref<8x16xf32, #tpu.memory_space<vmem>>, %arg6: memref<8x16xf32, #tpu.memory_space<vmem>>, %arg7: memref<8x16xf32, #tpu.memory_space<vmem>>) attributes {dimension_semantics = [#tpu.dimension_semantics<parallel>], iteration_bounds = array<i64: 1>, scalar_prefetch = 0 : i64, scratch_operands = 0 : i64, tpu.core_type = #tpu.core_type<tc>, window_params = [{transform_indices = @transform_0, window_bounds = array<i64: 8, 32>}, {pipeline_mode = #tpu.pipeline_mode<synchronous>, transform_indices = @transform_1, window_bounds = array<i64: 32, 32>}, {pipeline_mode = #tpu.pipeline_mode<synchronous>, transform_indices = @transform_2, window_bounds = array<i64: 1, 32>}, {transform_indices = @transform_3, window_bounds = array<i64: 8, 16>}, {transform_indices = @transform_4, window_bounds = array<i64: 8, 16>}, {transform_indices = @transform_5, window_bounds = array<i64: 8, 16>}, {transform_indices = @transform_6, window_bounds = array<i64: 8, 16>}]} {
    %c0 = arith.constant 0 : index
    %c0_0 = arith.constant 0 : index
    %0 = vector.load %arg1[%c0, %c0_0] : memref<8x32xf32, #tpu.memory_space<vmem>>, vector<8x32xf32>
    %c0_1 = arith.constant 0 : index
    %c0_2 = arith.constant 0 : index
    %1 = vector.load %arg2[%c0_1, %c0_2] : memref<32x32xf32, #tpu.memory_space<vmem>>, vector<32x32xf32>
    %cst = arith.constant dense<0.000000e+00> : vector<8x32xf32>
    %2 = tpu.matmul %0, %1, %cst {dimension_numbers = #tpu.dot_dimension_numbers<[1], [0], [0], [1], [0, 0, 1, 1], [], []>} : vector<8x32xf32>, vector<32x32xf32>, vector<8x32xf32> -> vector<8x32xf32>
    %c0_3 = arith.constant 0 : index
    %c0_4 = arith.constant 0 : index
    %3 = vector.load %arg3[%c0_3, %c0_4] : memref<1x32xf32, #tpu.memory_space<vmem>>, vector<1x32xf32>
    %4 = vector.broadcast %3 : vector<1x32xf32> to vector<8x32xf32>
    %5 = arith.addf %2, %4 : vector<8x32xf32>
    %6 = vector.extract_strided_slice %5 {offsets = [0, 0], sizes = [8, 16], strides = [1, 1]} : vector<8x32xf32> to vector<8x16xf32>
    %7 = vector.extract_strided_slice %5 {offsets = [0, 16], sizes = [8, 16], strides = [1, 1]} : vector<8x32xf32> to vector<8x16xf32>
    %cst_5 = arith.constant 5.000000e-01 : f32
    %8 = vector.broadcast %cst_5 : f32 to vector<8x16xf32>
    %9 = arith.mulf %7, %8 : vector<8x16xf32>
    %10 = math.exp %9 : vector<8x16xf32>
    %c0_6 = arith.constant 0 : index
    %c0_7 = arith.constant 0 : index
    %11 = vector.load %arg4[%c0_6, %c0_7] : memref<8x16xf32, #tpu.memory_space<vmem>>, vector<8x16xf32>
    %12 = arith.mulf %11, %10 : vector<8x16xf32>
    %13 = arith.addf %6, %12 : vector<8x16xf32>
    %c0_8 = arith.constant 0 : index
    %c0_9 = arith.constant 0 : index
    %14 = vector.load %arg5[%c0_8, %c0_9] : memref<8x16xf32, #tpu.memory_space<vmem>>, vector<8x16xf32>
    tpu.vector_store %arg5[%c0_8, %c0_9], %6 {strides = array<i32>} : memref<8x16xf32, #tpu.memory_space<vmem>>, vector<8x16xf32>,
    %c0_10 = arith.constant 0 : index
    %c0_11 = arith.constant 0 : index
    %15 = vector.load %arg6[%c0_10, %c0_11] : memref<8x16xf32, #tpu.memory_space<vmem>>, vector<8x16xf32>
    tpu.vector_store %arg6[%c0_10, %c0_11], %7 {strides = array<i32>} : memref<8x16xf32, #tpu.memory_space<vmem>>, vector<8x16xf32>,
    %c0_12 = arith.constant 0 : index
    %c0_13 = arith.constant 0 : index
    %16 = vector.load %arg7[%c0_12, %c0_13] : memref<8x16xf32, #tpu.memory_space<vmem>>, vector<8x16xf32>
    tpu.vector_store %arg7[%c0_12, %c0_13], %13 {strides = array<i32>} : memref<8x16xf32, #tpu.memory_space<vmem>>, vector<8x16xf32>,
    return
  }
  func.func @transform_0(%arg0: i32) -> (i32, i32) {
    %c0_i32 = arith.constant 0 : i32
    %c0_i32_0 = arith.constant 0 : i32
    return %arg0, %c0_i32 : i32, i32
  }
  func.func @transform_1(%arg0: i32) -> (i32, i32) {
    %c0_i32 = arith.constant 0 : i32
    %c0_i32_0 = arith.constant 0 : i32
    %c0_i32_1 = arith.constant 0 : i32
    return %c0_i32, %c0_i32_0 : i32, i32
  }
  func.func @transform_2(%arg0: i32) -> (i32, i32) {
    %c0_i32 = arith.constant 0 : i32
    %c0_i32_0 = arith.constant 0 : i32
    %c0_i32_1 = arith.constant 0 : i32
    return %c0_i32, %c0_i32_0 : i32, i32
  }
  func.func @transform_3(%arg0: i32) -> (i32, i32) {
    %c0_i32 = arith.constant 0 : i32
    %c0_i32_0 = arith.constant 0 : i32
    return %arg0, %c0_i32 : i32, i32
  }
  func.func @transform_4(%arg0: i32) -> (i32, i32) {
    %c0_i32 = arith.constant 0 : i32
    %c0_i32_0 = arith.constant 0 : i32
    return %arg0, %c0_i32 : i32, i32
  }
  func.func @transform_5(%arg0: i32) -> (i32, i32) {
    %c0_i32 = arith.constant 0 : i32
    %c0_i32_0 = arith.constant 0 : i32
    return %arg0, %c0_i32 : i32, i32
  }
  func.func @transform_6(%arg0: i32) -> (i32, i32) {
    %c0_i32 = arith.constant 0 : i32
    %c0_i32_0 = arith.constant 0 : i32
    return %arg0, %c0_i32 : i32, i32
  }
}

</mosaic_0001>

<bundles_post_ra>
// kernel: tpu_custom_call.1
= control target key start
LH: loop header
LB: loop body
LE: loop exit
PB: predicated region body
PF: predicated region fallthrough
CT: control target
= control target key end

     0   :  { %12 = vsyncpa [#allocation3], 0  ;;  %s472_s0 = inlined_call_operand.hbm [shape: f32[8,32], index: 0, kind: input, shape index: {}]   ;;  %s473_s1 = inlined_call_operand.hbm [shape: f32[32,32], index: 1, kind: input, shape index: {}]   ;;  %s474_s2 = inlined_call_operand.vmem [shape: f32[1,32], index: 2, kind: input, shape index: {}]   ;;  %s475_s3 = inlined_call_operand.vmem [shape: f32[8,16], index: 3, kind: input, shape index: {}]   ;;  %s476_s4 = inlined_call_operand.hbm [shape: f32[8,16], index: 4, kind: output, shape index: {0}]   ;;  %s477_s5 = inlined_call_operand.hbm [shape: f32[8,16], index: 5, kind: output, shape index: {1}]   ;;  %s478_s6 = inlined_call_operand.hbm [shape: f32[8,16], index: 6, kind: output, shape index: {2}]  }
   0x1   :  { %13 = vsyncpa [#allocation6], 0 }
   0x2   :  { %14 = vsyncpa [#allocation4], 0 }
   0x3   :  { %15 = vsyncpa [#allocation9], 0  ;;  %s350_s21 = smov [#allocation2]   ;;  %s351_s23 = smov [#allocation5]  }
   0x4   :  { %s22_s22 = sshll.u32 %s350_s21, 4  ;;  %s31_s24 = sshll.u32 %s351_s23, 4  ;;  %s23_s22 = int_to_ptr.vmem [resolvable:$true] %s22_s22  ;;  %s396_s24 = int_to_ptr.vmem [resolvable:$true] %s31_s24 }
   0x5   :  { %s232_s27 = scalar_lea.hbm %s472_s0, 128 }
   0x6   :  { %p233_p0 = scmp.ne.s32.totalorder %s472_s0, %s232_s27  ;;  %p236_p1 = scmp.lt.u32.totalorder %s232_s27, %s472_s0 }
   0x8   :  { %p238_p2 = pnand %p236_p1, %p233_p0 }
   0xa   :  { %241 = shalt.err (!%p238_p2)
}
   0xb   :  { %s242_s8 = scalar_lea.vmem %s23_s22, 128  ;;  %p247_p4 = scmp.lt.s32.totalorder %s23_s22, %s23_s22 }
   0xc   :  { %p243_p3 = scmp.ne.s32.totalorder %s23_s22, %s242_s8  ;;  %p248_p5 = scmp.lt.s32.totalorder %s242_s8, %s242_s8 }
   0xe   :  { %p249_p6 = por %p248_p5, %p247_p4 }
  0x10   :  { %p250_p7 = pnand %p249_p6, %p243_p3 }
  0x12   :  { %253 = shalt.err (!%p250_p7)
}
  0x13   :  { %25 = dma.hbm_to_vmem [thread:$0]  %s472_s0, 128, %s23_s22, [#allocation3]  }
  0x14   :  { %s254_s13 = scalar_lea.hbm %s473_s1, 512 }
  0x15   :  { %p255_p8 = scmp.ne.s32.totalorder %s473_s1, %s254_s13  ;;  %p258_p9 = scmp.lt.u32.totalorder %s254_s13, %s473_s1 }
  0x17   :  { %p260_p10 = pnand %p258_p9, %p255_p8 }
  0x19   :  { %263 = shalt.err (!%p260_p10)
}
  0x1a   :  { %s264_s18 = scalar_lea.vmem %s396_s24, 512  ;;  %p269_p12 = scmp.lt.s32.totalorder %s396_s24, %s396_s24 }
  0x1b   :  { %p265_p11 = scmp.ne.s32.totalorder %s396_s24, %s264_s18  ;;  %p270_p13 = scmp.lt.s32.totalorder %s264_s18, %s264_s18 }
  0x1d   :  { %p271_p0 = por %p270_p13, %p269_p12 }
  0x1f   :  { %p272_p1 = pnand %p271_p0, %p265_p11 }
  0x21   :  { %275 = shalt.err (!%p272_p1)
}
  0x22   :  { %s352_s0 = smov 128   ;;  %s353_s19 = smov 8  }
  0x23   :  { %37 = dma.hbm_to_vmem [thread:$0]  %s473_s1, 512, %s396_s24, [#allocation6], %s352_s0, %s352_s0, %s353_s19  }
  0x24   :  { %342 = dma.done.wait [#allocation3], 128  }
  0x25   :  { %343 = vsyncadd [#allocation3], 4294967168 }
  0x26   :  { %344 = dma.done.wait [#allocation6], 512  }
  0x27   :  { %345 = vsyncadd [#allocation6], 4294966784  ;;  %v354_v0 = vmov 0.0|0.0   ;;  %vm355_vm0 = vmmov 0   ;;  %v356_v1 = vmov 0.0   ;;  %v49_v2 = vld [vmem:[#allocation5] sm:$0xff] }
  0x28   :  { %213 = vmatprep.subr.bf16.mxu0 %v354_v0  ;;  %210 = vmatprep.mubr.msk.f32.mxu0 %vm355_vm0, %v356_v1  ;;  %v50_v3 = vld [vmem:[#allocation5 + $0x8] sm:$0xff]  ;;  %v51_v4 = vld [vmem:[#allocation5 + $0x10] sm:$0xff]  ;;  %v52_v6 = vld [vmem:[#allocation5 + $0x18] sm:$0xff]  ;;  %vm60_vm1 = vcmask 261120   ;;  %vm144_vm2 = vcmask 130048   ;;  %s357_s23 = smov [#allocation7]  }
  0x29   :  { %v214_v5 = vpack.c.bf16 %v50_v3, %v49_v2  ;;  %v217_v7 = vpack.c.bf16 %v52_v6, %v51_v4  ;;  %v48_v8 = vld [vmem:[#allocation2] sm:$0xff]  ;;  %s158_s24 = sshll.u32 %s357_s23, 4  ;;  %s159_s24 = int_to_ptr.vmem [resolvable:$true] %s158_s24 }
  0x2a   :  { %v195_v9 = vld [vmem:[%s474_s2] ss:$0 sm:$0xff]  ;;  %s276_s25 = scalar_lea.vmem %s159_s24, 128  ;;  %p281_p3 = scmp.lt.s32.totalorder %s159_s24, %s159_s24 }
  0x2b   :  { %215 = vmatpush3.bf16.msra.mxu0 %v214_v5  ;;  %p277_p2 = scmp.ne.s32.totalorder %s159_s24, %s276_s25  ;;  %p282_p4 = scmp.lt.s32.totalorder %s276_s25, %s276_s25 }
  0x2c   :  { %216 = vmatprep.subr.bf16.mxu0 %v354_v0 }
  0x2d   :  { %p283_p5 = por %p282_p4, %p281_p3 }
  0x2f   :  { %218 = vmatpush3.bf16.msra.mxu0 %v217_v7  ;;  %p284_p6 = pnand %p283_p5, %p277_p2 }
  0x32   :  { %211 = vmatmul.mubr.msk.f32.vlgmr.msra.gmra.mrb[0].mxu0 %vm60_vm1, %v48_v8 }
 0x105   :  { %v130_v10 = vpop.f32.mrb[0].mxu0 }
 0x106   :  { %v131_v11 = vadd.f32 %v195_v9, %v130_v10  ;;  %v212_v12 = vpop.f32.mrb[1].mxu0 }
 0x108   :  { %v134_v13 = vmul.f32 0.5, %v131_v11  ;;  %145 = vst.msk [vmem:[#allocation7] sm:$0xff] %vm144_vm2, %v131_v11 }
 0x10a   :  { %v135_v14 = vmul.f32 1.442695, %v134_v13 }
 0x10c   :  { %230 = vpow2.f32 %v135_v14 }
 0x10d   :  { %287 = shalt.err (!%p284_p6)
}
 0x10e   :  { %s288_s27 = scalar_lea.hbm %s476_s4, 128 }
 0x10f   :  { %p289_p7 = scmp.ne.s32.totalorder %s476_s4, %s288_s27  ;;  %p292_p8 = scmp.lt.u32.totalorder %s288_s27, %s476_s4 }
 0x111   :  { %p294_p9 = pnand %p292_p8, %p289_p7 }
 0x113   :  { %297 = shalt.err (!%p294_p9)
}
 0x114   :  { %161 = dma.vmem_to_hbm [thread:$0]  %s159_s24, 128, %s476_s4, [#allocation4]   ;;  %v137_v16 = vld [vmem:[%s475_s3] sm:$0xff] }
 0x115   :  { %s358_s10 = smov 112   ;;  %s359_s13 = smov [#allocation8]  }
 0x116   :  { %v231_v15 = vpop.eup %230  ;;  %s168_s14 = sshll.u32 %s359_s13, 4  ;;  %s360_s15 = smov [#allocation10]   ;;  %s169_s14 = int_to_ptr.vmem [resolvable:$true] %s168_s14 }
 0x117   :  { %139 = vrot.lane.b32.xlu0 %v231_v15, %s358_s10  ;;  %s178_s16 = sshll.u32 %s360_s15, 4  ;;  %s298_s4 = scalar_lea.vmem %s169_s14, 128  ;;  %s179_s16 = int_to_ptr.vmem [resolvable:$true] %s178_s16 }
 0x118   :  { %p299_p10 = scmp.ne.s32.totalorder %s169_s14, %s298_s4  ;;  %p303_p11 = scmp.lt.s32.totalorder %s169_s14, %s169_s14 }
 0x119   :  { %p304_p12 = scmp.lt.s32.totalorder %s298_s4, %s298_s4 }
 0x11b   :  { %147 = vrot.lane.b32.xlu0 %v131_v11, %s358_s10  ;;  %p305_p13 = por %p304_p12, %p303_p11 }
 0x11d   :  { %p306_p0 = pnand %p305_p13, %p299_p10 }
 0x189   :  { %v140_v17 = vpop.permute.xlu0 %139 }
 0x18a   :  { %v142_v18 = vmul.f32 %v140_v17, %v137_v16 }
 0x18c   :  { %v143_v19 = vadd.f32 %v142_v18, %v131_v11 }
 0x18d   :  { %v148_v20 = vpop.permute.xlu0 %147 }
 0x18e   :  { %150 = vst.msk [vmem:[#allocation8] sm:$0xff] %vm144_vm2, %v148_v20  ;;  %151 = vst.msk [vmem:[#allocation10] sm:$0xff] %vm144_vm2, %v143_v19 }
 0x18f   :  { %309 = shalt.err (!%p306_p0)
}
 0x190   :  { %s310_s18 = scalar_lea.hbm %s477_s5, 128 }
 0x191   :  { %p311_p1 = scmp.ne.s32.totalorder %s477_s5, %s310_s18  ;;  %p314_p2 = scmp.lt.u32.totalorder %s310_s18, %s477_s5 }
 0x193   :  { %p316_p3 = pnand %p314_p2, %p311_p1 }
 0x195   :  { %319 = shalt.err (!%p316_p3)
}
 0x196   :  { %171 = dma.vmem_to_hbm [thread:$0]  %s169_s14, 128, %s477_s5, [#allocation9]  }
 0x197   :  { %s320_s23 = scalar_lea.vmem %s179_s16, 128  ;;  %p325_p5 = scmp.lt.s32.totalorder %s179_s16, %s179_s16 }
 0x198   :  { %p321_p4 = scmp.ne.s32.totalorder %s179_s16, %s320_s23  ;;  %p326_p6 = scmp.lt.s32.totalorder %s320_s23, %s320_s23 }
 0x19a   :  { %p327_p7 = por %p326_p6, %p325_p5 }
 0x19c   :  { %p328_p8 = pnand %p327_p7, %p321_p4 }
 0x19e   :  { %331 = shalt.err (!%p328_p8)
}
 0x19f   :  { %s332_s2 = scalar_lea.hbm %s478_s6, 128 }
 0x1a0   :  { %p333_p9 = scmp.ne.s32.totalorder %s478_s6, %s332_s2  ;;  %p336_p10 = scmp.lt.u32.totalorder %s332_s2, %s478_s6 }
 0x1a2   :  { %p338_p11 = pnand %p336_p10, %p333_p9 }
 0x1a4   :  { %341 = shalt.err (!%p338_p11)
}
 0x1a5   :  { %181 = dma.vmem_to_hbm [thread:$0]  %s179_s16, 128, %s478_s6, [#allocation9]  }
 0x1a6   :  { %346 = dma.done.wait [#allocation4], 128  }
 0x1a7   :  { %347 = vsyncadd [#allocation4], 4294967168 }
 0x1a8   :  { %348 = dma.done.wait [#allocation9], 256  }
 0x1a9   :  { %349 = vsyncadd [#allocation9], 4294967040 }
 0x1aa   :  { %191 = vsyncpa [#allocation3], 1 }
 0x1ab   :  { %192 = vsyncpa [#allocation6], 1 }
 0x1ac   :  { %193 = vsyncpa [#allocation4], 1 }
 0x1ad   :  { %194 = vsyncpa [#allocation9], 1 }

</bundles_post_ra>
